<compile_context>
chip_gen: v7x
topology: tpu7x:2x2x1
jax: 0.10.0
libtpu: 0.0.40
codegen_flags: <defaults>
</compile_context>

<pallas_src>
import functools

import jax
import jax.numpy as jnp
import numpy as np
from jax.experimental import pallas as pl
from jax.experimental.pallas import tpu as pltpu

ALPHA = 0.25   # deterministic synthetic parameter (module default None is unusable)
GAMMA = 2      # module default

_TILE_TARGET_ELEMS = 1 << 20          # ~4 MiB of f32-equivalent logits per tile
_VMEM_LIMIT_BYTES = 32 * 1024 * 1024  # safe on v5e/v6e (128 MiB) and v7x (64 MiB/TC)


def _round_up(x, m):
    return ((x + m - 1) // m) * m


def _focal_loss_kernel(x_ref, t_ref, out_ref, *, alpha, gamma):
    """Per-row-tile focal loss; emits per-row losses (no carried state)."""
    x = x_ref[...].astype(jnp.float32)       # (TN, C) logits, upcast in VMEM
    t = t_ref[...]                           # (TN, 1) int32 labels

    # Numerically stable log-softmax pieces along the class (lane) axis.
    m = jnp.max(x, axis=-1, keepdims=True)   # (TN, 1)
    shifted = x - m                          # (TN, C) f32

    # Full-width exp: run on the EUP in bf16 when the input is bf16 (v6e/v7x
    # bf16 EUP ~2x throughput, smaller wide intermediate); keep f32 otherwise.
    if x_ref.dtype == jnp.bfloat16:
        e = jnp.exp(shifted.astype(jnp.bfloat16))
        denom = jnp.sum(e.astype(jnp.float32), axis=-1, keepdims=True)
    else:
        denom = jnp.sum(jnp.exp(shifted), axis=-1, keepdims=True)
    lse = jnp.log(denom)                     # (TN, 1)

    # Select the target-class column with compare+select (no one-hot
    # convert + multiply); everything below is (TN, 1)-narrow and f32.
    cls = jax.lax.broadcasted_iota(jnp.int32, shifted.shape, 1)
    shifted_t = jnp.sum(jnp.where(cls == t, shifted, 0.0),
                        axis=-1, keepdims=True)          # (TN, 1)

    logpt_t = shifted_t - lse                # log p_target
    pt_t = jnp.exp(logpt_t)                  # narrow exp only
    q = jnp.maximum(1.0 - pt_t, 0.0)         # clamp: rounding can give pt > 1
    if gamma == 2:                           # keep the power on the VPU
        qg = q * q
    elif gamma == 1:
        qg = q
    elif gamma == 0:
        qg = jnp.ones_like(q)
    else:
        qg = q ** gamma

    # focal_loss_row = -alpha * (1 - pt)**gamma * logpt  (target class only)
    out_ref[...] = (-alpha) * qg * logpt_t   # (TN, 1)


def focal_loss(ipt, target, *, alpha=ALPHA, gamma=GAMMA):
    """ipt: (N, C) float logits (any float dtype); target: (N,) ints. Scalar out."""
    N, C = ipt.shape
    itemsize = jnp.dtype(ipt.dtype).itemsize
    sub = max(8, 32 // itemsize)             # sublane multiple: 8 f32 / 16 bf16 / 32 i8

    # Degenerate tiny-N case only: pad by a handful of rows so the single
    # block is sublane-aligned (padded rows are sliced off before the mean).
    n = N
    if N < sub:
        ipt = jnp.pad(ipt, ((0, sub - N), (0, 0)))
        target = jnp.pad(target, (0, sub - N))
        n = sub
    t2 = target.reshape(n, 1).astype(jnp.int32)

    # Row-tile size: bytes-budgeted (~_TILE_TARGET_ELEMS logits per tile),
    # never larger than the array, and split >= 2 ways when possible so both
    # v7x TensorCores get work. The last tile may be ragged: Pallas drops the
    # out-of-bounds output rows, so no full-array padding is needed.
    budget_rows = max(sub, (_TILE_TARGET_ELEMS // max(C, 1)) // sub * sub)
    half_rows = _round_up(-(-n // 2), sub)
    br = max(sub, min(budget_rows, (n // sub) * sub, half_rows))
    grid = (pl.cdiv(n, br),)

    kernel = functools.partial(_focal_loss_kernel, alpha=float(alpha), gamma=gamma)
    per_row = pl.pallas_call(
        kernel,
        out_shape=jax.ShapeDtypeStruct((n, 1), jnp.float32),
        grid=grid,
        in_specs=[
            pl.BlockSpec((br, C), lambda i: (i, 0)),   # logits streamed in HBM dtype
            pl.BlockSpec((br, 1), lambda i: (i, 0)),   # targets
        ],
        out_specs=pl.BlockSpec((br, 1), lambda i: (i, 0)),
        compiler_params=pltpu.CompilerParams(
            dimension_semantics=("parallel",),          # no carried state -> megacore-friendly
            vmem_limit_bytes=_VMEM_LIMIT_BYTES),
    )(ipt, t2)

    # Tiny f32 reduction in the wrapper over the true N rows only
    # (output traffic is ~1/C of the input traffic).
    return jnp.sum(per_row[:N, 0]) / jnp.float32(N)


def _focal_loss_ref(ipt, target, alpha=ALPHA, gamma=GAMMA):
    """Pure-JAX reference mirroring the PyTorch forward."""
    C = ipt.shape[-1]
    onehot = jax.nn.one_hot(target, C, dtype=jnp.float32)
    logpt = jax.nn.log_softmax(ipt.astype(jnp.float32), axis=-1)
    pt = jnp.exp(logpt)
    focal = -alpha * (1.0 - pt) ** gamma * logpt
    loss = jnp.sum(onehot * focal, axis=-1)
    return jnp.mean(loss)


if __name__ == "__main__":
    key = jax.random.PRNGKey(0)

    # Case 1: small, divisible shapes (f32 logits).
    k_x, k_t = jax.random.split(key)
    N, C = 16, 32
    ipt = jax.random.normal(k_x, (N, C), dtype=jnp.float32)
    target = jax.random.randint(k_t, (N,), 0, C, dtype=jnp.int32)
    out = jax.block_until_ready(focal_loss(ipt, target))
    ref = jax.block_until_ready(_focal_loss_ref(ipt, target))
    np.testing.assert_allclose(np.asarray(out), np.asarray(ref),
                               rtol=1e-5, atol=1e-5)

    # Case 2: non-divisible N with bf16 logits streamed in bf16 (exercises the
    # ragged last tile and the bf16 EUP exp path).
    k_x2, k_t2 = jax.random.split(jax.random.PRNGKey(1))
    N2, C2 = 300, 32
    ipt2 = jax.random.normal(k_x2, (N2, C2), dtype=jnp.float32).astype(jnp.bfloat16)
    target2 = jax.random.randint(k_t2, (N2,), 0, C2, dtype=jnp.int32)
    out2 = jax.block_until_ready(focal_loss(ipt2, target2))
    ref2 = jax.block_until_ready(_focal_loss_ref(ipt2, target2))
    np.testing.assert_allclose(np.asarray(out2), np.asarray(ref2),
                               rtol=2e-2, atol=2e-2)

    # Case 3: ragged N with f32 logits (tight tolerance on the ragged path).
    k_x3, k_t3 = jax.random.split(jax.random.PRNGKey(2))
    N3, C3 = 70, 16
    ipt3 = jax.random.normal(k_x3, (N3, C3), dtype=jnp.float32)
    target3 = jax.random.randint(k_t3, (N3,), 0, C3, dtype=jnp.int32)
    out3 = jax.block_until_ready(focal_loss(ipt3, target3))
    ref3 = jax.block_until_ready(_focal_loss_ref(ipt3, target3))
    np.testing.assert_allclose(np.asarray(out3), np.asarray(ref3),
                               rtol=1e-5, atol=1e-5)

    print("KERNEL_OK")
</pallas_src>

<mosaic_0001>
module attributes {stable_mosaic.version = 11 : i64} {
  func.func @_focal_loss_kernel(%arg0: i32, %arg1: memref<8x32xf32, #tpu.memory_space<vmem>>, %arg2: memref<8x1xi32, #tpu.memory_space<vmem>>, %arg3: memref<8x1xf32, #tpu.memory_space<vmem>>) attributes {dimension_semantics = [#tpu.dimension_semantics<parallel>], iteration_bounds = array<i64: 2>, scalar_prefetch = 0 : i64, scratch_operands = 0 : i64, tpu.core_type = #tpu.core_type<tc>, window_params = [{transform_indices = @transform_0, window_bounds = array<i64: 8, 32>}, {transform_indices = @transform_1, window_bounds = array<i64: 8, 1>}, {transform_indices = @transform_2, window_bounds = array<i64: 8, 1>}]} {
    %c0 = arith.constant 0 : index
    %c0_0 = arith.constant 0 : index
    %0 = vector.load %arg1[%c0, %c0_0] : memref<8x32xf32, #tpu.memory_space<vmem>>, vector<8x32xf32>
    %c0_1 = arith.constant 0 : index
    %c0_2 = arith.constant 0 : index
    %1 = vector.load %arg2[%c0_1, %c0_2] : memref<8x1xi32, #tpu.memory_space<vmem>>, vector<8x1xi32>
    %cst = arith.constant dense<0xFF800000> : vector<8xf32>
    %2 = vector.multi_reduction <maximumf>, %0, %cst [1] : vector<8x32xf32> to vector<8xf32>
    %3 = vector.shape_cast %2 : vector<8xf32> to vector<8x1xf32>
    %4 = vector.broadcast %3 : vector<8x1xf32> to vector<8x32xf32>
    %5 = arith.subf %0, %4 : vector<8x32xf32>
    %6 = math.exp %5 : vector<8x32xf32>
    %cst_3 = arith.constant dense<0.000000e+00> : vector<8xf32>
    %7 = vector.multi_reduction <add>, %6, %cst_3 [1] : vector<8x32xf32> to vector<8xf32>
    %8 = vector.shape_cast %7 : vector<8xf32> to vector<8x1xf32>
    %9 = math.log %8 : vector<8x1xf32>
    %10 = tpu.iota {dimensions = array<i32: 1>} : vector<8x32xi32>
    %11 = vector.broadcast %1 : vector<8x1xi32> to vector<8x32xi32>
    %12 = arith.cmpi eq, %10, %11 : vector<8x32xi32>
    %cst_4 = arith.constant 0.000000e+00 : f32
    %13 = vector.broadcast %cst_4 : f32 to vector<8x32xf32>
    %14 = arith.select %12, %5, %13 : vector<8x32xi1>, vector<8x32xf32>
    %cst_5 = arith.constant dense<0.000000e+00> : vector<8xf32>
    %15 = vector.multi_reduction <add>, %14, %cst_5 [1] : vector<8x32xf32> to vector<8xf32>
    %16 = vector.shape_cast %15 : vector<8xf32> to vector<8x1xf32>
    %17 = arith.subf %16, %9 : vector<8x1xf32>
    %18 = math.exp %17 : vector<8x1xf32>
    %cst_6 = arith.constant 1.000000e+00 : f32
    %19 = vector.broadcast %cst_6 : f32 to vector<8x1xf32>
    %20 = arith.subf %19, %18 : vector<8x1xf32>
    %cst_7 = arith.constant 0.000000e+00 : f32
    %21 = vector.broadcast %cst_7 : f32 to vector<8x1xf32>
    %22 = arith.maximumf %20, %21 : vector<8x1xf32>
    %23 = arith.mulf %22, %22 : vector<8x1xf32>
    %cst_8 = arith.constant -2.500000e-01 : f32
    %24 = vector.broadcast %cst_8 : f32 to vector<8x1xf32>
    %25 = arith.mulf %24, %23 : vector<8x1xf32>
    %26 = arith.mulf %25, %17 : vector<8x1xf32>
    %c0_9 = arith.constant 0 : index
    %c0_10 = arith.constant 0 : index
    %27 = vector.load %arg3[%c0_9, %c0_10] : memref<8x1xf32, #tpu.memory_space<vmem>>, vector<8x1xf32>
    tpu.vector_store %arg3[%c0_9, %c0_10], %26 {strides = array<i32>} : memref<8x1xf32, #tpu.memory_space<vmem>>, vector<8x1xf32>,
    return
  }
  func.func @transform_0(%arg0: i32) -> (i32, i32) {
    %c0_i32 = arith.constant 0 : i32
    %c0_i32_0 = arith.constant 0 : i32
    return %arg0, %c0_i32 : i32, i32
  }
  func.func @transform_1(%arg0: i32) -> (i32, i32) {
    %c0_i32 = arith.constant 0 : i32
    %c0_i32_0 = arith.constant 0 : i32
    return %arg0, %c0_i32 : i32, i32
  }
  func.func @transform_2(%arg0: i32) -> (i32, i32) {
    %c0_i32 = arith.constant 0 : i32
    %c0_i32_0 = arith.constant 0 : i32
    return %arg0, %c0_i32 : i32, i32
  }
}

</mosaic_0001>

<bundles_post_ra>
// kernel: tpu_custom_call.1
= control target key start
LH: loop header
LB: loop body
LE: loop exit
PB: predicated region body
PF: predicated region fallthrough
CT: control target
= control target key end

     0   :  { %s305_s9 = smov 0   ;;  %s333_s0 = inlined_call_operand.vmem [shape: f32[16,32], index: 0, kind: input, shape index: {}]   ;;  %s334_s1 = inlined_call_operand.vmem [shape: s32[16,1], index: 1, kind: input, shape index: {}]   ;;  %s335_s2 = inlined_call_operand.vmem [shape: f32[16,1], index: 2, kind: output, shape index: {}]  }
   0x1 LB: > { %s255_s10 = sadd.s32 4294967295, %s287_s9   ;;  %p259_p0 = scmp.ge.s32.totalorder %s287_s9, 1  ;;  %s287_s9 = sphi %s305_s9, %s12_s9  }
   0x2   : > { %p120_p1 = scmp.lt.s32.totalorder %s287_s9, 3 }
   0x4   : > { %p121_p2 = pnand %p259_p0, %p120_p1 }
   0x5   : > { %p144_p3 = scmp.lt.s32.totalorder (!%p121_p2), %s255_s10, 1  ;;  %v289_v0 = vmov (!%p121_p2), 0   ;;  %vm158_vm0 = vcmask (!%p121_p2), 261120   ;;  %v170_v7 = vlaneseq (!%p121_p2)  ;;  %vm188_vm2 = vcmask (!%p121_p2), 7168  }
   0x6   : > { %124 = sbr.rel (%p121_p2) target bundleno = 357 (0x165), region = 28  ;;  %274 = vset.pattern.permute.xlu0 (!%p121_p2), %v289_v0 }
   0x7   : > { %v171_v8 = vand.u32 (!%p121_p2), 127, %v170_v7 }
   0xd   : > { %s337_s10 = smov (!%p144_p3, %s255_s10), 1 }
   0xe   : > { %s313_s11 = sshll.u32 %s337_s10, 3 }
   0xf   : > { %s147_s14 = scalar_lea.vmem %s333_s0, %s313_s11  ;;  %s151_s17 = scalar_lea.vmem %s334_s1, %s313_s11 }
  0x10   : > { %v156_v1 = vld [vmem:[%s147_s14] sm:$0xff]  ;;  %s155_s20 = scalar_lea.vmem %s335_s2, %s313_s11 }
  0x11   : > { %v159_v2 = vsel %vm158_vm0, %v156_v1, -inf  ;;  %v157_v3 = vld [vmem:[%s151_s17] sm:$0xff] }
  0x12   : > { %160 = vmax.xlane.f32.xlu0 %v159_v2 }
  0x28   : > { %173 = vperm.xlu0 %274, %v157_v3  }
  0x9f   : > { %v161_v4 = vpop.xlane.xlu0 %160 }
  0xa0   : > { %v162_v5 = vsub.f32 %v156_v1, %v161_v4 }
  0xa2   : > { %v163_v6 = vmul.f32 1.442695, %v162_v5 }
  0xa4   : > { %275 = vpow2.f32 %v163_v6 }
  0xa7   : > { %v174_v9 = vpop.permute.xlu0 %173 }
  0xa8   : > { %vm175_vm1 = vcmp.eq.s32.totalorder %v171_v8, %v174_v9 }
  0xa9   : > { %v176_v12 = vsel %vm175_vm1, %v162_v5, 0.0 }
  0xaa   : > { %v177_v13 = vsel %vm158_vm0, %v176_v12, 0.0 }
  0xae   : > { %v276_v10 = vpop.eup %275 }
  0xaf   : > { %v165_v11 = vsel %vm158_vm0, %v276_v10, 0.0 }
  0xb0   : > { %166 = vadd.xlane.f32.xlu1 %v165_v11 }
  0xb4   : > { %178 = vadd.xlane.f32.xlu1 %v177_v13 }
 0x13d   : > { %v167_v14 = vpop.xlane.xlu1 %166 }
 0x13e   : > { %277 = vlog2.f32 %v167_v14 }
 0x141   : > { %v179_v17 = vpop.xlane.xlu1 %178 }
 0x148   : > { %v278_v15 = vpop.eup %277 }
 0x149   : > { %v169_v16 = vmul.f32 0.6931472, %v278_v15 }
 0x14b   : > { %v180_v18 = vsub.f32 %v179_v17, %v169_v16 }
 0x14d   : > { %v181_v19 = vmul.f32 1.442695, %v180_v18 }
 0x14f   : > { %279 = vpow2.f32 %v181_v19 }
 0x159   : > { %v280_v20 = vpop.eup %279 }
 0x15a   : > { %v183_v21 = vsub.f32 1.0, %v280_v20 }
 0x15c   : > { %v184_v22 = vmax.f32 %v183_v21, 0.0 }
 0x15e   : > { %v185_v23 = vmul.f32 %v184_v22, %v184_v22 }
 0x160   : > { %v186_v24 = vmul.f32 -0.25, %v185_v23 }
 0x162   : > { %v187_v25 = vmul.f32 %v186_v24, %v180_v18 }
 0x164   : > { %189 = vst.msk [vmem:[%s155_s20] sm:$0xff] %vm188_vm2, %v187_v25 }
 0x165 PF: > { %s12_s9 = sadd.s32 1, %s287_s9  }
 0x166   : > { %p9_p4 = scmp.ge.s32.totalorder %s12_s9, 4  }
 0x168   :  { %11 = sbr.rel (!%p9_p4) target bundleno = 1 (0x1), region = 61 }

</bundles_post_ra>
